<compile_context>
chip_gen: v5e
topology: v5e:2x2
jax: 0.10.0
libtpu: 0.0.40
codegen_flags: <defaults>
</compile_context>

<pallas_src>
import functools

import jax
import jax.numpy as jnp
from jax.experimental import pallas as pl
from jax.experimental.pallas import tpu as pltpu

_LANE = 128
_SUBLANE = 8
_TARGET_STEP_BYTES = 8 << 20  # ~8 MiB of HBM traffic (both inputs) per grid step.


def _huber_kernel(pred_ref, gt_ref, out_ref, *, delta, rows, block_rows, needs_mask):
    i = pl.program_id(1)

    @pl.when(i == 0)
    def _():
        out_ref[...] = jnp.zeros_like(out_ref)

    p = pred_ref[...].astype(jnp.float32)
    g = gt_ref[...].astype(jnp.float32)
    d = p - g

    if needs_mask:
        # Only Pallas-padded ROWS of the last / duplicated blocks are garbage
        # (the <128-elem lane tail is explicit zeros, contributing 0), so a
        # row-only global-index mask is sufficient.
        blk = pl.program_id(0) * pl.num_programs(1) + i
        row = jax.lax.broadcasted_iota(jnp.int32, d.shape, 0)
        d = jnp.where(blk * block_rows + row < rows, d, 0.0)

    delta_f = jnp.float32(delta)
    ad = jnp.abs(d)
    c = jnp.minimum(ad, delta_f)          # branch-free Huber: c*(|d| - c/2)
    per_elem = c * (ad - 0.5 * c)

    # Fold the (block_rows,128) tile into a single (8,128) vreg of partial sums:
    # layout-preserving reshape + pure-VPU adds across vregs (no XLU until the
    # final reduction, which happens in JAX outside the kernel).
    out_ref[...] += per_elem.reshape(1, block_rows // _SUBLANE, _SUBLANE, _LANE).sum(axis=1)


def _sublane_multiple(dtype):
    # (8,128) for 32-bit; packed sub-32-bit dtypes prefer (16,128)/(32,128) blocks.
    return _SUBLANE * max(1, 4 // jnp.dtype(dtype).itemsize)


def huber_loss(pred, gt, delta=1.0, block_rows=None):
    """Equivalent of HuberLoss()(pred, gt.view_as(pred)) with mean reduction."""
    gt = gt.reshape(pred.shape)          # torch .view_as(pred): errors on size mismatch

    n = pred.size
    pf = pred.reshape(-1)
    gf = gt.reshape(-1)

    # Lane-align only the tiny tail (< 128 elems); the bulk of the data is not copied.
    pad = (-n) % _LANE
    if pad:
        pf = jnp.pad(pf, (0, pad))
        gf = jnp.pad(gf, (0, pad))
    rows = (n + pad) // _LANE
    pf = pf.reshape(rows, _LANE)
    gf = gf.reshape(rows, _LANE)

    isz_p = jnp.dtype(pred.dtype).itemsize
    isz_g = jnp.dtype(gt.dtype).itemsize
    sub = max(_sublane_multiple(pred.dtype), _sublane_multiple(gt.dtype))

    # Block row count: target ~8 MiB HBM traffic per step (dtype-scaled), rounded
    # to the dtype-appropriate sublane multiple, no larger than needed.
    if block_rows is None:
        block_rows = _TARGET_STEP_BYTES // (_LANE * (isz_p + isz_g))
    rows_rounded = -(-rows // sub) * sub
    block_rows = max(sub, min(int(block_rows), rows_rounded))
    block_rows = -(-block_rows // sub) * sub
    num_tiles = pl.cdiv(rows, block_rows)

    # Megacore split: 2 parallel slices on v7x (2 TCs); harmless serial loop on
    # v5e/v6e. Each slice owns its own (1,8,128) partial-sum output block.
    num_cores = 2 if num_tiles >= 2 else 1
    tiles_per_core = pl.cdiv(num_tiles, num_cores)

    # Mask is needed only when some grid step extends past the true row count
    # (ragged last block, or the duplicated clamped block of an odd tile split).
    needs_mask = (num_cores * tiles_per_core * block_rows) != rows

    def in_map(c, i):
        # Clamp so no block index is out of bounds; duplicated (clamped) steps are
        # fully masked out inside the kernel via the global row index.
        return (jnp.minimum(c * tiles_per_core + i, num_tiles - 1), 0)

    kernel = functools.partial(
        _huber_kernel, delta=float(delta), rows=int(rows),
        block_rows=int(block_rows), needs_mask=bool(needs_mask))

    # Double-buffered inputs + tiny output accumulator; raise scoped VMEM so the
    # large blocks also compile on v5e (16 MiB default scoped, 128 MiB physical).
    vmem_needed = 2 * block_rows * _LANE * (isz_p + isz_g) + num_cores * _SUBLANE * _LANE * 4
    vmem_limit = int(max(vmem_needed + (4 << 20), 24 << 20))

    partials = pl.pallas_call(
        kernel,
        out_shape=jax.ShapeDtypeStruct((num_cores, _SUBLANE, _LANE), jnp.float32),
        grid_spec=pltpu.PrefetchScalarGridSpec(
            num_scalar_prefetch=0,
            grid=(num_cores, tiles_per_core),
            in_specs=[
                pl.BlockSpec((block_rows, _LANE), in_map),
                pl.BlockSpec((block_rows, _LANE), in_map),
            ],
            out_specs=pl.BlockSpec((1, _SUBLANE, _LANE), lambda c, i: (c, 0, 0)),
        ),
        compiler_params=pltpu.CompilerParams(
            dimension_semantics=("parallel", "arbitrary"),
            vmem_limit_bytes=vmem_limit),
    )(pf, gf)

    # Tiny final reduction (num_cores*8*128 f32) + divide-by-N in JAX.
    return jnp.sum(partials) / jnp.float32(n)


def _ref_huber(pred, gt, delta=1.0):
    d = pred.astype(jnp.float32) - gt.reshape(pred.shape).astype(jnp.float32)
    ad = jnp.abs(d)
    return jnp.mean(jnp.where(ad <= delta, 0.5 * d * d, delta * (ad - 0.5 * delta)))


if __name__ == "__main__":
    key = jax.random.PRNGKey(0)
    k1, k2, k3, k4, k5, k6, k7, k8 = jax.random.split(key, 8)

    # Case 1: lane-aligned f32, single block, no mask; gt given flat (view_as path).
    pred = jax.random.normal(k1, (2, 4, 16, 16), dtype=jnp.float32)
    gt = jax.random.normal(k2, (2 * 4 * 16 * 16,), dtype=jnp.float32)
    loss = jax.block_until_ready(huber_loss(pred, gt))
    assert jnp.allclose(loss, _ref_huber(pred, gt), rtol=1e-5, atol=1e-6), loss

    # Case 2: ragged element count (small tail pad + in-kernel row mask, single block).
    pred2 = jax.random.normal(k3, (3, 7, 25), dtype=jnp.float32)
    gt2 = jax.random.normal(k4, (3 * 7 * 25,), dtype=jnp.float32)
    loss2 = jax.block_until_ready(huber_loss(pred2, gt2))
    assert jnp.allclose(loss2, _ref_huber(pred2, gt2), rtol=1e-5, atol=1e-6), loss2

    # Case 3: multi-step grid, 2-way core split with an odd tile count (clamped
    # duplicated block + ragged last block -> mask path).
    pred3 = jax.random.normal(k5, (2, 10, 128), dtype=jnp.float32)
    gt3 = jax.random.normal(k6, (2, 10, 128), dtype=jnp.float32)
    loss3 = jax.block_until_ready(huber_loss(pred3, gt3, block_rows=8))
    assert jnp.allclose(loss3, _ref_huber(pred3, gt3), rtol=1e-5, atol=1e-6), loss3

    # Case 4: bf16 inputs kept in bf16 in HBM (cast in-kernel), aligned 2-way split.
    pred4 = jax.random.normal(k7, (2, 16, 128), dtype=jnp.bfloat16)
    gt4 = jax.random.normal(k8, (2, 16, 128), dtype=jnp.bfloat16)
    loss4 = jax.block_until_ready(huber_loss(pred4, gt4, block_rows=16))
    assert jnp.allclose(loss4, _ref_huber(pred4, gt4), rtol=1e-5, atol=1e-5), loss4

    print("KERNEL_OK")
</pallas_src>

<mosaic_0001>
module attributes {stable_mosaic.version = 11 : i64} {
  func.func @_huber_kernel(%arg0: i32, %arg1: i32, %arg2: memref<16x128xf32, #tpu.memory_space<vmem>>, %arg3: memref<16x128xf32, #tpu.memory_space<vmem>>, %arg4: memref<1x8x128xf32, #tpu.memory_space<vmem>>) attributes {dimension_semantics = [#tpu.dimension_semantics<parallel>, #tpu.dimension_semantics<arbitrary>], iteration_bounds = array<i64: 1, 1>, scalar_prefetch = 0 : i64, scratch_operands = 0 : i64, tpu.core_type = #tpu.core_type<tc>, window_params = [{transform_indices = @transform_0, window_bounds = array<i64: 16, 128>}, {transform_indices = @transform_1, window_bounds = array<i64: 16, 128>}, {transform_indices = @transform_2, window_bounds = array<i64: 1, 8, 128>}]} {
    %c0_i32 = arith.constant 0 : i32
    %0 = arith.cmpi eq, %arg1, %c0_i32 : i32
    %1 = arith.extui %0 : i1 to i32
    %c0_i32_0 = arith.constant 0 : i32
    %2 = arith.cmpi ne, %1, %c0_i32_0 : i32
    scf.if %2 {
      %cst_12 = arith.constant 0.000000e+00 : f32
      %18 = vector.broadcast %cst_12 : f32 to vector<1x8x128xf32>
      %c0_13 = arith.constant 0 : index
      %c0_14 = arith.constant 0 : index
      %c0_15 = arith.constant 0 : index
      %19 = vector.load %arg4[%c0_13, %c0_14, %c0_15] : memref<1x8x128xf32, #tpu.memory_space<vmem>>, vector<1x8x128xf32>
      tpu.vector_store %arg4[%c0_13, %c0_14, %c0_15], %18 {strides = array<i32>} : memref<1x8x128xf32, #tpu.memory_space<vmem>>, vector<1x8x128xf32>,
    } else {
    }
    %c0 = arith.constant 0 : index
    %c0_1 = arith.constant 0 : index
    %3 = vector.load %arg2[%c0, %c0_1] : memref<16x128xf32, #tpu.memory_space<vmem>>, vector<16x128xf32>
    %c0_2 = arith.constant 0 : index
    %c0_3 = arith.constant 0 : index
    %4 = vector.load %arg3[%c0_2, %c0_3] : memref<16x128xf32, #tpu.memory_space<vmem>>, vector<16x128xf32>
    %5 = arith.subf %3, %4 : vector<16x128xf32>
    %6 = math.absf %5 : vector<16x128xf32>
    %cst = arith.constant 1.000000e+00 : f32
    %7 = vector.broadcast %cst : f32 to vector<16x128xf32>
    %8 = arith.minimumf %6, %7 : vector<16x128xf32>
    %cst_4 = arith.constant 5.000000e-01 : f32
    %9 = vector.broadcast %cst_4 : f32 to vector<16x128xf32>
    %10 = arith.mulf %9, %8 : vector<16x128xf32>
    %11 = arith.subf %6, %10 : vector<16x128xf32>
    %12 = arith.mulf %8, %11 : vector<16x128xf32>
    %c0_5 = arith.constant 0 : index
    %c0_6 = arith.constant 0 : index
    %c0_7 = arith.constant 0 : index
    %13 = vector.load %arg4[%c0_5, %c0_6, %c0_7] : memref<1x8x128xf32, #tpu.memory_space<vmem>>, vector<1x8x128xf32>
    %14 = vector.shape_cast %12 : vector<16x128xf32> to vector<1x2x8x128xf32>
    %cst_8 = arith.constant dense<0.000000e+00> : vector<1x8x128xf32>
    %15 = vector.multi_reduction <add>, %14, %cst_8 [1] : vector<1x2x8x128xf32> to vector<1x8x128xf32>
    %16 = arith.addf %13, %15 : vector<1x8x128xf32>
    %c0_9 = arith.constant 0 : index
    %c0_10 = arith.constant 0 : index
    %c0_11 = arith.constant 0 : index
    %17 = vector.load %arg4[%c0_9, %c0_10, %c0_11] : memref<1x8x128xf32, #tpu.memory_space<vmem>>, vector<1x8x128xf32>
    tpu.vector_store %arg4[%c0_9, %c0_10, %c0_11], %16 {strides = array<i32>} : memref<1x8x128xf32, #tpu.memory_space<vmem>>, vector<1x8x128xf32>,
    return
  }
  func.func @transform_0(%arg0: i32, %arg1: i32) -> (i32, i32) {
    %c1_i32 = arith.constant 1 : i32
    %0 = arith.muli %arg0, %c1_i32 : i32
    %1 = arith.addi %0, %arg1 : i32
    %c0_i32 = arith.constant 0 : i32
    %2 = arith.minsi %1, %c0_i32 : i32
    %c0_i32_0 = arith.constant 0 : i32
    %c0_i32_1 = arith.constant 0 : i32
    return %2, %c0_i32_0 : i32, i32
  }
  func.func @transform_1(%arg0: i32, %arg1: i32) -> (i32, i32) {
    %c1_i32 = arith.constant 1 : i32
    %0 = arith.muli %arg0, %c1_i32 : i32
    %1 = arith.addi %0, %arg1 : i32
    %c0_i32 = arith.constant 0 : i32
    %2 = arith.minsi %1, %c0_i32 : i32
    %c0_i32_0 = arith.constant 0 : i32
    %c0_i32_1 = arith.constant 0 : i32
    return %2, %c0_i32_0 : i32, i32
  }
  func.func @transform_2(%arg0: i32, %arg1: i32) -> (i32, i32, i32) {
    %c0_i32 = arith.constant 0 : i32
    %c0_i32_0 = arith.constant 0 : i32
    %c0_i32_1 = arith.constant 0 : i32
    return %arg0, %c0_i32, %c0_i32_0 : i32, i32, i32
  }
}

</mosaic_0001>

<bundles_post_ra>
// kernel: tpu_custom_call.1
= control target key start
LH: loop header
LB: loop body
LE: loop exit
PB: predicated region body
PF: predicated region fallthrough
CT: control target
= control target key end

     0   :  { %7 = vsyncpa [#allocation3], 0  ;;  %s224_s0 = inlined_call_operand.hbm [shape: f32[16,128], index: 0, kind: input, shape index: {}]   ;;  %s225_s1 = inlined_call_operand.hbm [shape: f32[16,128], index: 1, kind: input, shape index: {}]   ;;  %s226_s2 = inlined_call_operand.hbm [shape: f32[1,8,128], index: 2, kind: output, shape index: {}]  }
   0x1   :  { %8 = vsyncpa [#allocation6], 0 }
   0x2   :  { %9 = vsyncpa [#allocation4], 0  ;;  %s20_s11 = sshll.u32 %s224_s0, 4  ;;  %s195_s12 = smov [#allocation2]   ;;  %s21_s11 = int_to_ptr.hbm [resolvable:$true] %s20_s11 }
   0x3   :  { %s22_s13 = sshll.u32 %s195_s12, 4  ;;  %s39_s16 = sshll.u32 %s225_s1, 4  ;;  %s23_s13 = int_to_ptr.vmem [resolvable:$true] %s22_s13  ;;  %s40_s16 = int_to_ptr.hbm [resolvable:$true] %s39_s16 }
   0x4   :  { %s196_s17 = smov 128   ;;  %s197_s18 = smov 8  }
   0x5   :  { %28 = dma.hbm_to_vmem [thread:$0]  %s21_s11, 256, %s23_s13, [#allocation3], %s196_s17, %s196_s17, %s197_s18  }
   0x6   :  { %s198_s19 = smov [#allocation5]  }
   0x7   :  { %s41_s20 = sshll.u32 %s198_s19, 4  ;;  %s42_s20 = int_to_ptr.vmem [resolvable:$true] %s41_s20 }
   0x8   :  { %47 = dma.hbm_to_vmem [thread:$0]  %s40_s16, 256, %s42_s20, [#allocation6], %s196_s17, %s196_s17, %s197_s18  }
   0x9   :  { %189 = dma.done.wait [#allocation3], 256  }
   0xa   :  { %190 = vsyncadd [#allocation3], 4294967040 }
   0xb   :  { %191 = dma.done.wait [#allocation6], 256  }
   0xc   :  { %192 = vsyncadd [#allocation6], 4294967040  ;;  %v69_v0 = vld [vmem:[#allocation2] sm:$0xff]  ;;  %v70_v1 = vld [vmem:[#allocation2 + $0x8] sm:$0xff]  ;;  %s199_s0 = smov [#allocation7]   ;;  %s96_s23 = sshll.u32 %s226_s2, 4  ;;  %s97_s23 = int_to_ptr.hbm [resolvable:$true] %s96_s23 }
   0xd   :  { %v71_v2 = vld [vmem:[#allocation5] sm:$0xff]  ;;  %v72_v3 = vld [vmem:[#allocation5 + $0x8] sm:$0xff]  ;;  %s94_s1 = sshll.u32 %s199_s0, 4  ;;  %s95_s1 = int_to_ptr.vmem [resolvable:$true] %s94_s1 }
   0xe   :  { %v73_v4 = vsub.f32 %v69_v0, %v71_v2  ;;  %v74_v5 = vsub.f32 %v70_v1, %v72_v3 }
  0x10   :  { %v75_v6 = vand.u32 2147483647, %v73_v4  ;;  %v76_v7 = vand.u32 2147483647, %v74_v5 }
  0x12   :  { %v77_v8 = vmin.f32 %v75_v6, 1.0  ;;  %v78_v9 = vmin.f32 %v76_v7, 1.0 }
  0x14   :  { %v79_v10 = vmul.f32 0.5, %v77_v8  ;;  %v80_v11 = vmul.f32 0.5, %v78_v9 }
  0x16   :  { %v81_v12 = vsub.f32 %v75_v6, %v79_v10  ;;  %v82_v13 = vsub.f32 %v76_v7, %v80_v11 }
  0x18   :  { %v83_v14 = vmul.f32 %v81_v12, %v77_v8  ;;  %v84_v15 = vmul.f32 %v82_v13, %v78_v9 }
  0x1a   :  { %v86_v16 = vadd.f32 %v84_v15, %v83_v14 }
  0x1c   :  { %88 = vst [vmem:[#allocation7] sm:$0xff] %v86_v16 }
  0x1d   :  { %99 = dma.vmem_to_hbm [thread:$0]  %s95_s1, 128, %s97_s23, [#allocation4]  }
  0x1e   :  { %193 = dma.done.wait [#allocation4], 128  }
  0x1f   :  { %194 = vsyncadd [#allocation4], 4294967168 }
  0x20   :  { %104 = vsyncpa [#allocation3], 1 }
  0x21   :  { %105 = vsyncpa [#allocation6], 1 }
  0x22   :  { %106 = vsyncpa [#allocation4], 1 }

</bundles_post_ra>
